<compile_context>
chip_gen: v7x
topology: tpu7x:2x2x1
jax: 0.10.0
libtpu: 0.0.40
codegen_flags: <defaults>
</compile_context>

<pallas_src>
import functools

import jax
import jax.numpy as jnp
from jax.experimental import pallas as pl
from jax.experimental.pallas import tpu as pltpu


def _round_up(a: int, m: int) -> int:
    return (a + m - 1) // m * m


# --------------------------------------------------------------------------
# Kernel: one fused (linear + bias + tanh) tile, lane-dense (128-wide) output.
# --------------------------------------------------------------------------
def diag_gaussian_mean_kernel(x_ref, w_ref, b_ref, mean_ref, *, matmul_dtype):
    # In-kernel cast is free: the kernel is HBM-DMA-bound, VPU has huge slack.
    x = x_ref[...].astype(matmul_dtype)
    w = w_ref[...].astype(matmul_dtype)
    acc = jnp.dot(x, w, preferred_element_type=jnp.float32)   # MXU, f32 accum
    # Bias add + tanh kept in f32 on VPU/EUP (v5e has no bf16 vector path).
    mean_ref[...] = jnp.tanh(acc + b_ref[...]).astype(mean_ref.dtype)


# --------------------------------------------------------------------------
# One-time parameter packing: pad N up to a divisor of 128 and build the
# block-diagonal "folded" weight so `fold` consecutive batch rows map onto
# the 128-lane axis (unmasked full-width stores).
# --------------------------------------------------------------------------
def pack_params(w, b, *, max_w_vmem_bytes=2 << 20):
    """w: (K, N) f32 (already transposed so kernel computes x @ w); b: (1, N)."""
    K, N = w.shape
    if N >= 128:
        n_pad = _round_up(N, 128)
        fold = 1
    else:
        n_pad = 1 << (N - 1).bit_length()        # next pow2 -> divides 128
        fold = 128 // n_pad
    # Auto-reduce fold so the resident block-diagonal weight (fold^2 * K * Np)
    # cannot silently blow past VMEM for large num_inputs.
    while fold > 1 and (fold * K) * (fold * n_pad) * 4 > max_w_vmem_bytes:
        fold //= 2

    w_p = jnp.pad(w.astype(jnp.float32), ((0, 0), (0, n_pad - N)))           # (K, Np)
    b_p = jnp.pad(b.reshape(1, N).astype(jnp.float32), ((0, 0), (0, n_pad - N)))

    if fold > 1:
        eye = jnp.eye(fold, dtype=jnp.float32)
        # Block f of the contraction dim maps to output block f, i.e. original
        # batch row (i*fold + f).
        w_f = (eye[:, None, :, None] * w_p[None, :, None, :]).reshape(
            fold * K, fold * n_pad)
        b_f = jnp.tile(b_p, (1, fold))
    else:
        w_f, b_f = w_p, b_p

    return dict(w=w_f, b=b_f,                    # folded params, kept in f32
                w_raw=w.astype(jnp.float32), b_raw=b.reshape(1, N).astype(jnp.float32),
                K=K, N=N, n_pad=n_pad, fold=fold)


# --------------------------------------------------------------------------
# Pallas path on the folded view.
# --------------------------------------------------------------------------
def _pallas_mean_folded(x_f, w_f, b_f, *, block_rows, matmul_dtype, mean_dtype):
    """x_f: (bf, k_fused) f32 -> mean (bf, n_lanes) mean_dtype."""
    bf, k_fused = x_f.shape
    _, n_lanes = w_f.shape

    # Tile in fused-row units; sublane dim must be a multiple of 8.
    tbf = min(_round_up(max(block_rows, 8), 8), _round_up(bf, 8))

    # Conservative VMEM estimate: double-buffered x + out tiles, resident W + b.
    def vmem_bytes(t):
        return (2 * (t * k_fused * 4 + t * n_lanes * 4)
                + 2 * (k_fused * n_lanes * 4 + n_lanes * 4))

    budget = 40 << 20                       # safe on v5e/v6e/v7x
    while tbf > 8 and vmem_bytes(tbf) > budget:
        tbf = max(8, _round_up(tbf // 2, 8))
    vmem_limit = int(min(56 << 20, max(32 << 20, vmem_bytes(tbf) + (8 << 20))))

    grid = (pl.cdiv(bf, tbf),)              # ragged last block handled by Pallas
    kernel = functools.partial(diag_gaussian_mean_kernel, matmul_dtype=matmul_dtype)
    return pl.pallas_call(
        kernel,
        out_shape=jax.ShapeDtypeStruct((bf, n_lanes), mean_dtype),
        grid_spec=pltpu.PrefetchScalarGridSpec(
            num_scalar_prefetch=0,
            grid=grid,
            in_specs=[
                pl.BlockSpec((tbf, k_fused), lambda i: (i, 0)),       # x tile (f32)
                pl.BlockSpec((k_fused, n_lanes), lambda i: (0, 0)),   # W (resident)
                pl.BlockSpec((1, n_lanes), lambda i: (0, 0)),         # b (resident)
            ],
            out_specs=pl.BlockSpec((tbf, n_lanes), lambda i: (i, 0)),
        ),
        compiler_params=pltpu.CompilerParams(
            dimension_semantics=("parallel",),   # batch axis -> v7x's 2 TCs split it
            vmem_limit_bytes=vmem_limit,
        ),
    )(x_f, w_f, b_f)


def _xla_mean(x, w, b, matmul_dtype):
    acc = jnp.dot(x.astype(matmul_dtype), w.astype(matmul_dtype),
                  preferred_element_type=jnp.float32)
    return jnp.tanh(acc + b)


def diag_gaussian_forward(x, packed, logstd, *, block_rows=2048,
                          matmul_dtype=jnp.bfloat16, mean_dtype=jnp.float32):
    """x: (B, K) f32. Returns (mean (B, N), std (1, N) f32)."""
    B, K = x.shape
    assert K == packed["K"], "feature dim mismatch"
    N, n_pad, fold = packed["N"], packed["n_pad"], packed["fold"]

    n_tail = B % fold
    n_bulk = B - n_tail
    parts = []
    if n_bulk > 0:
        x_bulk = x if n_tail == 0 else x[:n_bulk]
        # Row-major reshape folds `fold` consecutive rows into lanes: a free
        # bitcast (no HBM pass), unlike the old pad+astype path.
        x_f = x_bulk.reshape(n_bulk // fold, fold * K)
        mean_f = _pallas_mean_folded(x_f, packed["w"], packed["b"],
                                     block_rows=block_rows,
                                     matmul_dtype=matmul_dtype,
                                     mean_dtype=mean_dtype)
        parts.append(mean_f.reshape(n_bulk, n_pad)[:, :N])
    if n_tail > 0:
        # Ragged fold tail (< fold rows): fused XLA is cheaper than padding the
        # whole batch; same operand-dtype math as the kernel for consistency.
        parts.append(_xla_mean(x[n_bulk:], packed["w_raw"], packed["b_raw"],
                               matmul_dtype).astype(mean_dtype))
    mean = parts[0] if len(parts) == 1 else jnp.concatenate(parts, axis=0)

    # std = exp(logstd) is batch-invariant -> (1, N); Normal broadcasting covers
    # consumers.  # TODO(synk): broadcast to (B, N) only if a consumer indexes
    # std per batch row (costs a (B, N) HBM write).
    std = jnp.exp(logstd.reshape(1, N).astype(jnp.float32))
    return mean, std


def diag_gaussian_apply(x, w, b, logstd, *, packed=None, min_pallas_rows=8192,
                        matmul_dtype=jnp.bfloat16):
    """Dispatcher: small batches use fused XLA (custom-call + pipeline setup
    overhead beats any Pallas gain); large batches stream through the kernel."""
    if x.shape[0] < min_pallas_rows:
        mean = jnp.tanh(x @ w + b.reshape(1, -1))
        return mean, jnp.exp(logstd.reshape(1, -1))
    if packed is None:
        packed = pack_params(w, b)
    return diag_gaussian_forward(x, packed, logstd, matmul_dtype=matmul_dtype)


def init_params(key, num_inputs, num_outputs, gain=0.01):
    """Mirror the PyTorch __init__: orthogonal weight scaled by gain, zero bias,
    zero logstd."""
    w_t = jax.nn.initializers.orthogonal(scale=gain)(
        key, (num_outputs, num_inputs), jnp.float32)
    w = w_t.T                                    # (K, N) so kernel does x @ w
    b = jnp.zeros((1, num_outputs), jnp.float32)
    logstd = jnp.zeros((1, num_outputs), jnp.float32)
    return w, b, logstd


if __name__ == "__main__":
    key = jax.random.PRNGKey(0)
    k_x, k_w, k_x2 = jax.random.split(key, 3)

    num_inputs, num_outputs = 32, 8
    w, b, logstd = init_params(k_w, num_inputs, num_outputs)
    packed = pack_params(w, b)

    def ref_mean_bf16(xx):
        # Same math the kernel performs: bf16 operands, f32 accumulation.
        return jnp.tanh(jnp.dot(xx.astype(jnp.bfloat16), w.astype(jnp.bfloat16),
                                preferred_element_type=jnp.float32) + b)

    # ---- Small batch through the Pallas path (fold=16 -> bf=16, grid=(1,)) ----
    batch = 256
    x = jax.random.normal(k_x, (batch, num_inputs), jnp.float32)
    mean, std = diag_gaussian_forward(x, packed, logstd)
    jax.block_until_ready((mean, std))
    assert mean.shape == (batch, num_outputs)
    assert std.shape == (1, num_outputs)
    assert jnp.allclose(mean, ref_mean_bf16(x), atol=1e-4, rtol=1e-4)
    # Loose check vs pure-f32 PyTorch semantics (bf16 matmul operands).
    assert jnp.allclose(mean, jnp.tanh(x @ w + b), atol=2e-3, rtol=2e-2)
    assert jnp.allclose(std, jnp.exp(logstd), atol=1e-6, rtol=1e-6)

    # ---- Larger batch, ragged everywhere: B % fold != 0 and bf % tbf != 0 ----
    batch2 = 4100                       # bulk 4096 rows via Pallas + 4-row tail
    x2 = jax.random.normal(k_x2, (batch2, num_inputs), jnp.float32)
    mean2, std2 = diag_gaussian_forward(x2, packed, logstd, block_rows=40)
    jax.block_until_ready((mean2, std2))
    assert mean2.shape == (batch2, num_outputs)
    assert jnp.allclose(mean2, ref_mean_bf16(x2), atol=1e-4, rtol=1e-4)
    assert jnp.allclose(std2, jnp.exp(logstd), atol=1e-6, rtol=1e-6)

    print("KERNEL_OK")
</pallas_src>

<mosaic_0001>
module attributes {stable_mosaic.version = 11 : i64} {
  func.func @diag_gaussian_mean_kernel(%arg0: i32, %arg1: memref<16x512xf32, #tpu.memory_space<vmem>>, %arg2: memref<512x128xf32, #tpu.memory_space<vmem>>, %arg3: memref<1x128xf32, #tpu.memory_space<vmem>>, %arg4: memref<16x128xf32, #tpu.memory_space<vmem>>) attributes {dimension_semantics = [#tpu.dimension_semantics<parallel>], iteration_bounds = array<i64: 1>, scalar_prefetch = 0 : i64, scratch_operands = 0 : i64, tpu.core_type = #tpu.core_type<tc>, window_params = [{transform_indices = @transform_0, window_bounds = array<i64: 16, 512>}, {pipeline_mode = #tpu.pipeline_mode<synchronous>, transform_indices = @transform_1, window_bounds = array<i64: 512, 128>}, {pipeline_mode = #tpu.pipeline_mode<synchronous>, transform_indices = @transform_2, window_bounds = array<i64: 1, 128>}, {transform_indices = @transform_3, window_bounds = array<i64: 16, 128>}]} {
    %c0 = arith.constant 0 : index
    %c0_0 = arith.constant 0 : index
    %0 = vector.load %arg1[%c0, %c0_0] : memref<16x512xf32, #tpu.memory_space<vmem>>, vector<16x512xf32>
    %1 = arith.truncf %0 : vector<16x512xf32> to vector<16x512xbf16>
    %c0_1 = arith.constant 0 : index
    %c0_2 = arith.constant 0 : index
    %2 = vector.load %arg2[%c0_1, %c0_2] : memref<512x128xf32, #tpu.memory_space<vmem>>, vector<512x128xf32>
    %3 = arith.truncf %2 : vector<512x128xf32> to vector<512x128xbf16>
    %cst = arith.constant dense<0.000000e+00> : vector<16x128xf32>
    %4 = tpu.matmul %1, %3, %cst {dimension_numbers = #tpu.dot_dimension_numbers<[1], [0], [0], [1], [0, 0, 1, 1], [], []>} : vector<16x512xbf16>, vector<512x128xbf16>, vector<16x128xf32> -> vector<16x128xf32>
    %c0_3 = arith.constant 0 : index
    %c0_4 = arith.constant 0 : index
    %5 = vector.load %arg3[%c0_3, %c0_4] : memref<1x128xf32, #tpu.memory_space<vmem>>, vector<1x128xf32>
    %6 = vector.broadcast %5 : vector<1x128xf32> to vector<16x128xf32>
    %7 = arith.addf %4, %6 : vector<16x128xf32>
    %8 = math.tanh %7 : vector<16x128xf32>
    %c0_5 = arith.constant 0 : index
    %c0_6 = arith.constant 0 : index
    %9 = vector.load %arg4[%c0_5, %c0_6] : memref<16x128xf32, #tpu.memory_space<vmem>>, vector<16x128xf32>
    tpu.vector_store %arg4[%c0_5, %c0_6], %8 {strides = array<i32>} : memref<16x128xf32, #tpu.memory_space<vmem>>, vector<16x128xf32>,
    return
  }
  func.func @transform_0(%arg0: i32) -> (i32, i32) {
    %c0_i32 = arith.constant 0 : i32
    %c0_i32_0 = arith.constant 0 : i32
    return %arg0, %c0_i32 : i32, i32
  }
  func.func @transform_1(%arg0: i32) -> (i32, i32) {
    %c0_i32 = arith.constant 0 : i32
    %c0_i32_0 = arith.constant 0 : i32
    %c0_i32_1 = arith.constant 0 : i32
    return %c0_i32, %c0_i32_0 : i32, i32
  }
  func.func @transform_2(%arg0: i32) -> (i32, i32) {
    %c0_i32 = arith.constant 0 : i32
    %c0_i32_0 = arith.constant 0 : i32
    %c0_i32_1 = arith.constant 0 : i32
    return %c0_i32, %c0_i32_0 : i32, i32
  }
  func.func @transform_3(%arg0: i32) -> (i32, i32) {
    %c0_i32 = arith.constant 0 : i32
    %c0_i32_0 = arith.constant 0 : i32
    return %arg0, %c0_i32 : i32, i32
  }
}

</mosaic_0001>

<bundles_post_ra>
// kernel: tpu_custom_call.1
= control target key start
LH: loop header
LB: loop body
LE: loop exit
PB: predicated region body
PF: predicated region fallthrough
CT: control target
= control target key end

     0   :  { %8 = vsyncpa [#allocation3], 0  ;;  %s463_s0 = inlined_call_operand.hbm [shape: f32[16,512], index: 0, kind: input, shape index: {}]   ;;  %s464_s1 = inlined_call_operand.hbm [shape: f32[512,128], index: 1, kind: input, shape index: {}]   ;;  %s465_s2 = inlined_call_operand.vmem [shape: f32[1,128], index: 2, kind: input, shape index: {}]   ;;  %s466_s3 = inlined_call_operand.hbm [shape: f32[16,128], index: 3, kind: output, shape index: {}]  }
   0x1   :  { %9 = vsyncpa [#allocation6], 0 }
   0x2   :  { %10 = vsyncpa [#allocation4], 0  ;;  %s391_s12 = smov [#allocation2]   ;;  %s319_s16 = scalar_lea.hbm %s463_s0, 1024 }
   0x3   :  { %s16_s13 = sshll.u32 %s391_s12, 4  ;;  %p320_p0 = scmp.ne.s32.totalorder %s463_s0, %s319_s16  ;;  %s17_s13 = int_to_ptr.vmem [resolvable:$true] %s16_s13 }
   0x4   :  { %p323_p1 = scmp.lt.u32.totalorder %s319_s16, %s463_s0 }
   0x6   :  { %p325_p2 = pnand %p323_p1, %p320_p0 }
   0x8   :  { %328 = shalt.err (!%p325_p2)
}
   0x9   :  { %s329_s21 = scalar_lea.vmem %s17_s13, 1024  ;;  %p334_p4 = scmp.lt.s32.totalorder %s17_s13, %s17_s13 }
   0xa   :  { %p330_p3 = scmp.ne.s32.totalorder %s17_s13, %s329_s21  ;;  %p335_p5 = scmp.lt.s32.totalorder %s329_s21, %s329_s21 }
   0xc   :  { %p336_p6 = por %p335_p5, %p334_p4 }
   0xe   :  { %p337_p7 = pnand %p336_p6, %p330_p3 }
  0x10   :  { %340 = shalt.err (!%p337_p7)
}
  0x11   :  { %s392_s22 = smov 512   ;;  %s393_s23 = smov 32  }
  0x12   :  { %22 = dma.hbm_to_vmem [thread:$0]  %s463_s0, 1024, %s17_s13, [#allocation3], %s392_s22, %s392_s22, %s393_s23  }
  0x13   :  { %s394_s26 = smov [#allocation5]   ;;  %s341_s30 = scalar_lea.hbm %s464_s1, 8192 }
  0x14   :  { %s28_s27 = sshll.u32 %s394_s26, 4  ;;  %p342_p8 = scmp.ne.s32.totalorder %s464_s1, %s341_s30  ;;  %s29_s27 = int_to_ptr.vmem [resolvable:$true] %s28_s27 }
  0x15   :  { %p345_p9 = scmp.lt.u32.totalorder %s341_s30, %s464_s1 }
  0x17   :  { %p347_p10 = pnand %p345_p9, %p342_p8 }
  0x19   :  { %350 = shalt.err (!%p347_p10)
}
  0x1a   :  { %s351_s8 = scalar_lea.vmem %s29_s27, 8192  ;;  %p356_p12 = scmp.lt.s32.totalorder %s29_s27, %s29_s27 }
  0x1b   :  { %p352_p11 = scmp.ne.s32.totalorder %s29_s27, %s351_s8  ;;  %p357_p13 = scmp.lt.s32.totalorder %s351_s8, %s351_s8 }
  0x1d   :  { %p358_p0 = por %p357_p13, %p356_p12 }
  0x1f   :  { %p359_p1 = pnand %p358_p0, %p352_p11 }
  0x21   :  { %362 = shalt.err (!%p359_p1)
}
  0x22   :  { %s395_s0 = smov 128   ;;  %s396_s9 = smov 8  }
  0x23   :  { %34 = dma.hbm_to_vmem [thread:$0]  %s464_s1, 8192, %s29_s27, [#allocation6], %s395_s0, %s395_s0, %s396_s9  }
  0x24   :  { %385 = dma.done.wait [#allocation3], 1024  }
  0x25   :  { %386 = vsyncadd [#allocation3], 4294966272 }
  0x26   :  { %387 = dma.done.wait [#allocation6], 8192  }
  0x27   :  { %388 = vsyncadd [#allocation6], 4294959104  ;;  %v72_v0 = vld [vmem:[#allocation5 + $0x80] sm:$0xff]  ;;  %v73_v1 = vld [vmem:[#allocation5 + $0x88] sm:$0xff]  ;;  %s397_s13 = smov [#allocation7]  }
  0x28   :  { %v104_v2 = vld [vmem:[#allocation5 + $0x180] sm:$0xff]  ;;  %v128_v3 = vpack.c.bf16 %v73_v1, %v72_v0  ;;  %v105_v4 = vld [vmem:[#allocation5 + $0x188] sm:$0xff]  ;;  %v74_v11 = vld [vmem:[#allocation5 + $0x90] sm:$0xff]  ;;  %s250_s14 = sshll.u32 %s397_s13, 4  ;;  %s251_s14 = int_to_ptr.vmem [resolvable:$true] %s250_s14 }
  0x29   :  { %v56_v5 = vld [vmem:[#allocation5] sm:$0xff]  ;;  %v57_v6 = vld [vmem:[#allocation5 + $0x8] sm:$0xff]  ;;  %v144_v7 = vpack.c.bf16 %v105_v4, %v104_v2  ;;  %v75_v13 = vld [vmem:[#allocation5 + $0x98] sm:$0xff]  ;;  %p368_p3 = scmp.lt.s32.totalorder %s251_s14, %s251_s14 }
  0x2a   :  { %v120_v8 = vpack.c.bf16 %v57_v6, %v56_v5  ;;  %v88_v9 = vld [vmem:[#allocation5 + $0x100] sm:$0xff]  ;;  %v89_v10 = vld [vmem:[#allocation5 + $0x108] sm:$0xff]  ;;  %264 = vmatprep.subr.bf16.mxu0 %v128_v3  ;;  %v106_v14 = vld [vmem:[#allocation5 + $0x190] sm:$0xff]  ;;  %v129_v16 = vpack.c.bf16 %v75_v13, %v74_v11 }
  0x2b   :  { %v136_v12 = vpack.c.bf16 %v89_v10, %v88_v9  ;;  %v107_v15 = vld [vmem:[#allocation5 + $0x198] sm:$0xff]  ;;  %286 = vmatprep.subr.bf16.mxu1 %v144_v7  ;;  %v58_v18 = vld [vmem:[#allocation5 + $0x10] sm:$0xff]  ;;  %v76_v23 = vld [vmem:[#allocation5 + $0xa0] sm:$0xff] }
  0x2c   :  { %265 = vmatpush3.bf16.msra.mxu0 %v120_v8  ;;  %v145_v17 = vpack.c.bf16 %v107_v15, %v106_v14  ;;  %v59_v19 = vld [vmem:[#allocation5 + $0x18] sm:$0xff]  ;;  %v90_v20 = vld [vmem:[#allocation5 + $0x110] sm:$0xff]  ;;  %v77_v24 = vld [vmem:[#allocation5 + $0xa8] sm:$0xff] }
  0x2d   :  { %287 = vmatpush3.bf16.msra.mxu1 %v136_v12  ;;  %v121_v21 = vpack.c.bf16 %v59_v19, %v58_v18  ;;  %v91_v22 = vld [vmem:[#allocation5 + $0x118] sm:$0xff]  ;;  %266 = vmatprep.subr.bf16.mxu0 %v129_v16  ;;  %v130_v26 = vpack.c.bf16 %v77_v24, %v76_v23  ;;  %v108_v27 = vld [vmem:[#allocation5 + $0x1a0] sm:$0xff]  ;;  %v109_v28 = vld [vmem:[#allocation5 + $0x1a8] sm:$0xff] }
  0x2e   :  { %288 = vmatprep.subr.bf16.mxu1 %v145_v17  ;;  %v137_v25 = vpack.c.bf16 %v91_v22, %v90_v20  ;;  %v60_v29 = vld [vmem:[#allocation5 + $0x20] sm:$0xff]  ;;  %v146_v30 = vpack.c.bf16 %v109_v28, %v108_v27  ;;  %v61_v31 = vld [vmem:[#allocation5 + $0x28] sm:$0xff]  ;;  %v78_v35 = vld [vmem:[#allocation5 + $0xb0] sm:$0xff] }
  0x2f   :  { %v92_v32 = vld [vmem:[#allocation5 + $0x120] sm:$0xff]  ;;  %v93_v33 = vld [vmem:[#allocation5 + $0x128] sm:$0xff]  ;;  %v122_v34 = vpack.c.bf16 %v61_v31, %v60_v29  ;;  %v79_v36 = vld [vmem:[#allocation5 + $0xb8] sm:$0xff] }
  0x30   :  { %267 = vmatpush3.bf16.msra.mxu0 %v121_v21  ;;  %v110_v37 = vld [vmem:[#allocation5 + $0x1b0] sm:$0xff]  ;;  %v138_v38 = vpack.c.bf16 %v93_v33, %v92_v32  ;;  %v131_v39 = vpack.c.bf16 %v79_v36, %v78_v35  ;;  %v111_v40 = vld [vmem:[#allocation5 + $0x1b8] sm:$0xff]  ;;  %v80_v46 = vld [vmem:[#allocation5 + $0xc0] sm:$0xff] }
  0x31   :  { %289 = vmatpush3.bf16.msra.mxu1 %v137_v25  ;;  %268 = vmatprep.subr.bf16.mxu0 %v130_v26  ;;  %v62_v41 = vld [vmem:[#allocation5 + $0x30] sm:$0xff]  ;;  %v63_v42 = vld [vmem:[#allocation5 + $0x38] sm:$0xff]  ;;  %v147_v43 = vpack.c.bf16 %v111_v40, %v110_v37  ;;  %v81_v47 = vld [vmem:[#allocation5 + $0xc8] sm:$0xff] }
  0x32   :  { %290 = vmatprep.subr.bf16.mxu1 %v146_v30  ;;  %v94_v44 = vld [vmem:[#allocation5 + $0x130] sm:$0xff]  ;;  %v95_v45 = vld [vmem:[#allocation5 + $0x138] sm:$0xff]  ;;  %v112_v48 = vld [vmem:[#allocation5 + $0x1c0] sm:$0xff]  ;;  %v123_v50 = vpack.c.bf16 %v63_v42, %v62_v41  ;;  %v132_v52 = vpack.c.bf16 %v81_v47, %v80_v46 }
  0x33   :  { %v113_v49 = vld [vmem:[#allocation5 + $0x1c8] sm:$0xff]  ;;  %v139_v51 = vpack.c.bf16 %v95_v45, %v94_v44  ;;  %v64_v53 = vld [vmem:[#allocation5 + $0x40] sm:$0xff]  ;;  %v82_v58 = vld [vmem:[#allocation5 + $0xd0] sm:$0xff] }
  0x34   :  { %269 = vmatpush3.bf16.msra.mxu0 %v122_v34  ;;  %v65_v54 = vld [vmem:[#allocation5 + $0x48] sm:$0xff]  ;;  %v96_v55 = vld [vmem:[#allocation5 + $0x140] sm:$0xff]  ;;  %v148_v56 = vpack.c.bf16 %v113_v49, %v112_v48  ;;  %v83_v59 = vld [vmem:[#allocation5 + $0xd8] sm:$0xff] }
  0x35   :  { %291 = vmatpush3.bf16.msra.mxu1 %v138_v38  ;;  %270 = vmatprep.subr.bf16.mxu0 %v131_v39  ;;  %v97_v57 = vld [vmem:[#allocation5 + $0x148] sm:$0xff]  ;;  %v114_v60 = vld [vmem:[#allocation5 + $0x1d0] sm:$0xff]  ;;  %v115_v61 = vld [vmem:[#allocation5 + $0x1d8] sm:$0xff]  ;;  %v124_v62 = vpack.c.bf16 %v65_v54, %v64_v53  ;;  %v133_v0 = vpack.c.bf16 %v83_v59, %v82_v58 }
  0x36   :  { %292 = vmatprep.subr.bf16.mxu1 %v147_v43  ;;  %v140_v63 = vpack.c.bf16 %v97_v57, %v96_v55  ;;  %v66_v1 = vld [vmem:[#allocation5 + $0x50] sm:$0xff]  ;;  %v67_v2 = vld [vmem:[#allocation5 + $0x58] sm:$0xff]  ;;  %v149_v4 = vpack.c.bf16 %v115_v61, %v114_v60  ;;  %v84_v6 = vld [vmem:[#allocation5 + $0xe0] sm:$0xff] }
  0x37   :  { %v98_v3 = vld [vmem:[#allocation5 + $0x150] sm:$0xff]  ;;  %v99_v5 = vld [vmem:[#allocation5 + $0x158] sm:$0xff]  ;;  %v85_v7 = vld [vmem:[#allocation5 + $0xe8] sm:$0xff]  ;;  %v125_v11 = vpack.c.bf16 %v67_v2, %v66_v1 }
  0x38   :  { %271 = vmatpush3.bf16.msra.mxu0 %v123_v50  ;;  %v116_v8 = vld [vmem:[#allocation5 + $0x1e0] sm:$0xff]  ;;  %v117_v9 = vld [vmem:[#allocation5 + $0x1e8] sm:$0xff]  ;;  %v141_v15 = vpack.c.bf16 %v99_v5, %v98_v3  ;;  %v134_v16 = vpack.c.bf16 %v85_v7, %v84_v6  ;;  %v86_v17 = vld [vmem:[#allocation5 + $0xf0] sm:$0xff] }
  0x39   :  { %293 = vmatpush3.bf16.msra.mxu1 %v139_v51  ;;  %272 = vmatprep.subr.bf16.mxu0 %v132_v52  ;;  %v68_v10 = vld [vmem:[#allocation5 + $0x60] sm:$0xff]  ;;  %v69_v12 = vld [vmem:[#allocation5 + $0x68] sm:$0xff]  ;;  %v150_v20 = vpack.c.bf16 %v117_v9, %v116_v8  ;;  %v87_v21 = vld [vmem:[#allocation5 + $0xf8] sm:$0xff] }
  0x3a   :  { %294 = vmatprep.subr.bf16.mxu1 %v148_v56  ;;  %v100_v13 = vld [vmem:[#allocation5 + $0x160] sm:$0xff]  ;;  %v101_v14 = vld [vmem:[#allocation5 + $0x168] sm:$0xff]  ;;  %v47_v23 = vld [vmem:[#allocation2 + $0x18] sm:$0xff]  ;;  %v126_v28 = vpack.c.bf16 %v69_v12, %v68_v10  ;;  %v135_v30 = vpack.c.bf16 %v87_v21, %v86_v17 }
  0x3b   :  { %v45_v18 = vld [vmem:[#allocation2 + $0x8] sm:$0xff]  ;;  %v51_v24 = vld [vmem:[#allocation2 + $0x38] sm:$0xff]  ;;  %v118_v25 = vld [vmem:[#allocation5 + $0x1f0] sm:$0xff]  ;;  %v142_v29 = vpack.c.bf16 %v101_v14, %v100_v13 }
  0x3c   :  { %273 = vmatpush3.bf16.msra.mxu0 %v124_v62  ;;  %v49_v19 = vld [vmem:[#allocation2 + $0x28] sm:$0xff]  ;;  %v119_v26 = vld [vmem:[#allocation5 + $0x1f8] sm:$0xff]  ;;  %v55_v27 = vpack.c.bf16 %v51_v24, %v47_v23  ;;  %v70_v31 = vld [vmem:[#allocation5 + $0x70] sm:$0xff] }
  0x3d   :  { %295 = vmatpush3.bf16.msra.mxu1 %v140_v63  ;;  %274 = vmatprep.subr.bf16.mxu0 %v133_v0  ;;  %v53_v22 = vpack.c.bf16 %v49_v19, %v45_v18  ;;  %v71_v32 = vld [vmem:[#allocation5 + $0x78] sm:$0xff]  ;;  %v151_v33 = vpack.c.bf16 %v119_v26, %v118_v25  ;;  %v102_v34 = vld [vmem:[#allocation5 + $0x170] sm:$0xff]  ;;  %v44_v37 = vld [vmem:[#allocation2] sm:$0xff] }
  0x3e   :  { %296 = vmatprep.subr.bf16.mxu1 %v149_v4  ;;  %v103_v35 = vld [vmem:[#allocation5 + $0x178] sm:$0xff]  ;;  %232 = vmatprep.mubr.bf16.mxu1 %v55_v27  ;;  %v127_v36 = vpack.c.bf16 %v71_v32, %v70_v31  ;;  %v48_v38 = vld [vmem:[#allocation2 + $0x20] sm:$0xff]  ;;  %v46_v40 = vld [vmem:[#allocation2 + $0x10] sm:$0xff] }
  0x3f   :  { %191 = vmatprep.mubr.bf16.mxu0 %v53_v22  ;;  %v143_v39 = vpack.c.bf16 %v103_v35, %v102_v34  ;;  %v50_v41 = vld [vmem:[#allocation2 + $0x30] sm:$0xff]  ;;  %v52_v42 = vpack.c.bf16 %v48_v38, %v44_v37  ;;  %v263_v46 = vld [vmem:[%s465_s2] ss:$0 sm:$0xff]  ;;  %s363_s2 = scalar_lea.vmem %s251_s14, 256 }
  0x40   :  { %275 = vmatpush3.bf16.msra.mxu0 %v125_v11  ;;  %v54_v43 = vpack.c.bf16 %v50_v41, %v46_v40  ;;  %p364_p2 = scmp.ne.s32.totalorder %s251_s14, %s363_s2  ;;  %p369_p4 = scmp.lt.s32.totalorder %s363_s2, %s363_s2 }
  0x41   :  { %297 = vmatpush3.bf16.msra.mxu1 %v141_v15  ;;  %276 = vmatprep.subr.bf16.mxu0 %v134_v16 }
  0x42   :  { %298 = vmatprep.subr.bf16.mxu1 %v150_v20  ;;  %p370_p5 = por %p369_p4, %p368_p3 }
  0x44   :  { %277 = vmatpush3.bf16.msra.mxu0 %v126_v28  ;;  %p371_p6 = pnand %p370_p5, %p364_p2 }
  0x45   :  { %299 = vmatpush3.bf16.msra.mxu1 %v142_v29  ;;  %278 = vmatprep.subr.bf16.mxu0 %v135_v30 }
  0x46   :  { %300 = vmatprep.subr.bf16.mxu1 %v151_v33 }
  0x48   :  { %279 = vmatpush3.bf16.msra.mxu0 %v127_v36 }
  0x49   :  { %301 = vmatpush3.bf16.msra.mxu1 %v143_v39 }
  0x4b   :  { %192 = vmatmul.mubr.bf16.vlgmr.msra.gmra.mrb[0].mxu0 %v52_v42 }
  0x4c   :  { %233 = vmatmul.mubr.bf16.vlgmr.msra.gmra.mrb[0].mxu1 %v54_v43 }
 0x11e   :  { %v280_v44 = vpop.f32.mrb[0].mxu0 }
 0x11f   :  { %v302_v45 = vpop.f32.mrb[0].mxu1  ;;  %v281_v47 = vpop.f32.mrb[1].mxu0 }
 0x120   :  { %v282_v48 = vadd.f32 %v281_v47, %v280_v44  ;;  %v303_v49 = vpop.f32.mrb[1].mxu1  ;;  %v283_v50 = vpop.f32.mrb[2].mxu0 }
 0x121   :  { %v304_v51 = vadd.f32 %v303_v49, %v302_v45  ;;  %v305_v52 = vpop.f32.mrb[2].mxu1  ;;  %v284_v53 = vpop.f32.mrb[3].mxu0 }
 0x122   :  { %v194_v54 = vadd.f32 %v282_v48, %v263_v46  ;;  %v285_v55 = vadd.f32 %v284_v53, %v283_v50  ;;  %v306_v56 = vpop.f32.mrb[3].mxu1 }
 0x123   :  { %v307_v57 = vadd.f32 %v306_v56, %v305_v52 }
 0x124   :  { %v235_v58 = vadd.f32 %v304_v51, %v194_v54  ;;  %v197_v59 = vadd.f32 %v285_v55, %v263_v46 }
 0x126   :  { %315 = vtanh.f32 %v235_v58  ;;  %v238_v60 = vadd.f32 %v307_v57, %v197_v59 }
 0x128   :  { %317 = vtanh.f32 %v238_v60 }
 0x130   :  { %v316_v61 = vpop.eup %315 }
 0x131   :  { %243 = vst [vmem:[#allocation7] sm:$0xff] %v316_v61 }
 0x132   :  { %v318_v62 = vpop.eup %317 }
 0x133   :  { %244 = vst [vmem:[#allocation7 + $0x8] sm:$0xff] %v318_v62 }
 0x134   :  { %374 = shalt.err (!%p371_p6)
}
 0x135   :  { %s375_s17 = scalar_lea.hbm %s466_s3, 256 }
 0x136   :  { %p376_p7 = scmp.ne.s32.totalorder %s466_s3, %s375_s17  ;;  %p379_p8 = scmp.lt.u32.totalorder %s375_s17, %s466_s3 }
 0x138   :  { %p381_p9 = pnand %p379_p8, %p376_p7 }
 0x13a   :  { %384 = shalt.err (!%p381_p9)
}
 0x13b   :  { %256 = dma.vmem_to_hbm [thread:$0]  %s251_s14, 256, %s466_s3, [#allocation4], %s395_s0, %s395_s0, %s396_s9  }
 0x13c   :  { %389 = dma.done.wait [#allocation4], 256  }
 0x13d   :  { %390 = vsyncadd [#allocation4], 4294967040 }
 0x13e   :  { %260 = vsyncpa [#allocation3], 1 }
 0x13f   :  { %261 = vsyncpa [#allocation6], 1 }
 0x140   :  { %262 = vsyncpa [#allocation4], 1 }

</bundles_post_ra>
